<compile_context>
chip_gen: v6e
topology: v6e:2x2x1
jax: 0.10.0
libtpu: 0.0.40
codegen_flags: <defaults>
</compile_context>

<pallas_src>
import functools

import jax
import jax.numpy as jnp
from jax.experimental import pallas as pl
from jax.experimental.pallas import tpu as pltpu


_MIB = 1024 * 1024
_VMEM_LIMIT_BYTES = 32 * _MIB      # <= default scoped VMEM on v6e/v7x, raises v5e's 16 MiB
_FUSED_SLAB_LIMIT = 6 * _MIB       # per-batch (1, C, HW) block; ~4x this when double-buffered
_DEFAULT_TILE_BYTES = 4 * _MIB     # fallback streaming tile size


# ---------------------------------------------------------------------------
# Fused fast path: pool -> FC gate -> scale, one grid step per batch element.
# ---------------------------------------------------------------------------
def _fused_kernel(x_ref, w1_ref, b1_ref, w2t_ref, b2_ref, o_ref, *, inv_hw):
    # x_ref/o_ref: (1, C, HW) native dtype.  Gate params are small f32 VMEM
    # blocks laid out so the tiny FC needs no transposes:
    #   w1 (C, Cr), b1 (1, Cr), w2t = w2.T (C, Cr), b2 (C, 1).
    x = x_ref[0]                                                          # (C, HW)

    # Squeeze: f32 spatial mean per channel (lane reduction on the XLU).
    pooled = jnp.sum(x.astype(jnp.float32), axis=-1, keepdims=True) * inv_hw   # (C, 1)

    # Excite: FC1 (sublane reduce) -> ReLU -> FC2 (lane reduce) -> sigmoid.
    h = jnp.sum(pooled * w1_ref[...], axis=0, keepdims=True) + b1_ref[...]     # (1, Cr)
    h = jnp.maximum(h, 0.0)
    z = jnp.sum(h * w2t_ref[...], axis=-1, keepdims=True) + b2_ref[...]        # (C, 1)
    y = jax.nn.sigmoid(z).astype(x.dtype)                                      # (C, 1)

    # Scale: channel-wise multiply in the native dtype.
    o_ref[0] = x * y


# ---------------------------------------------------------------------------
# Fallback pass 1: global average pool (squeeze).  Accumulates the spatial sum
# in f32 directly in the resident (1, c_tile, 1) output block; the reduction
# grid axis is last and marked "arbitrary".
# ---------------------------------------------------------------------------
def _pool_kernel(x_ref, sum_ref):
    @pl.when(pl.program_id(2) == 0)
    def _():
        sum_ref[...] = jnp.zeros_like(sum_ref)

    sum_ref[...] += jnp.sum(x_ref[...].astype(jnp.float32), axis=-1, keepdims=True)


# ---------------------------------------------------------------------------
# Fallback pass 2: channel-wise scale.  Gate is pre-cast to x.dtype in the
# wrapper, so the inner loop is exactly one vmul per element.
# ---------------------------------------------------------------------------
def _scale_kernel(y_ref, x_ref, o_ref):
    o_ref[...] = x_ref[...] * y_ref[...]


# ---------------------------------------------------------------------------
# Tile selection helpers.
# ---------------------------------------------------------------------------
def _pick_hw_tile(hw, c, itemsize, max_tile_bytes):
    """Largest lane-aligned (multiple of 128) divisor of `hw` whose
    (1, c, tile) block stays under the byte budget.  If no aligned divisor
    fits, fall back to the largest divisor under the budget (possibly
    unaligned -> masked stores, but never blows scoped VMEM)."""
    max_elems = max(1, max_tile_bytes // max(1, c * itemsize))
    limit = min(hw, max_elems)

    best = 0
    d = 128
    while d <= limit:
        if hw % d == 0:
            best = d
        d += 128
    if best:
        return best

    # TODO(synk): for HW with no 128-aligned divisor (e.g. 49, 196), pad/mask
    # to a 128-dense lane axis instead of accepting sub-128 masked stores.
    for d in range(limit, 0, -1):
        if hw % d == 0:
            return d
    return 1


def _pick_c_tile(c, itemsize, n_parallel_b):
    """Split the channel axis so the grid has >= 2 parallel units of work when
    the batch axis alone is too small (keeps both v7x TensorCores busy at
    B == 1).  The tile stays a divisor of C and a multiple of the sublane
    packing (8 f32 / 16 bf16 / 32 int8).  No effect on single-TC v5e/v6e."""
    sub = 8 * max(1, 4 // itemsize)
    if n_parallel_b >= 2 or c % (2 * sub) != 0:
        return c
    return c // 2


# ---------------------------------------------------------------------------
# Wrapper.
# ---------------------------------------------------------------------------
def attention_layer(x, w1, b1, w2, b2, *,
                    max_tile_bytes=_DEFAULT_TILE_BYTES,
                    force_two_pass=False):
    """SE-style attention.  x: (B, C, H, W).  Weights use the y = x @ W + b
    convention (w1: (C, C//r), w2: (C//r, C); transpose of torch Linear.weight)."""
    B, C, H, W = x.shape
    HW = H * W
    Cr = w1.shape[1]
    itemsize = x.dtype.itemsize
    x_flat = x.reshape(B, C, HW)

    # Gate math stays in f32 regardless of the streaming dtype.
    w1f = w1.astype(jnp.float32)                      # (C, Cr)
    b1f = b1.astype(jnp.float32).reshape(1, Cr)       # (1, Cr)
    w2f = w2.astype(jnp.float32)                      # (Cr, C)
    w2tf = w2f.T                                      # (C, Cr)
    b2f = b2.astype(jnp.float32).reshape(C, 1)        # (C, 1)

    slab_bytes = C * HW * itemsize
    if not force_two_pass and slab_bytes <= _FUSED_SLAB_LIMIT:
        # ---- Fused fast path: one pallas_call, grid over the batch only. ----
        out_flat = pl.pallas_call(
            functools.partial(_fused_kernel, inv_hw=1.0 / HW),
            out_shape=jax.ShapeDtypeStruct((B, C, HW), x.dtype),
            grid=(B,),
            in_specs=[
                pl.BlockSpec((1, C, HW), lambda b: (b, 0, 0)),   # x slab
                pl.BlockSpec((C, Cr), lambda b: (0, 0)),         # w1
                pl.BlockSpec((1, Cr), lambda b: (0, 0)),         # b1
                pl.BlockSpec((C, Cr), lambda b: (0, 0)),         # w2.T
                pl.BlockSpec((C, 1), lambda b: (0, 0)),          # b2
            ],
            out_specs=pl.BlockSpec((1, C, HW), lambda b: (b, 0, 0)),
            compiler_params=pltpu.CompilerParams(
                dimension_semantics=("parallel",),
                vmem_limit_bytes=_VMEM_LIMIT_BYTES),
        )(x_flat, w1f, b1f, w2tf, b2f)
        return out_flat.reshape(B, C, H, W)

    # ---- Fallback: two streaming passes for slabs too big to fuse. ---------
    c_tile = _pick_c_tile(C, itemsize, B)
    hw_tile = _pick_hw_tile(HW, c_tile, itemsize, max_tile_bytes)
    n_c = C // c_tile
    n_t = HW // hw_tile

    # Pass 1: per-(b, c) spatial sums, f32 accumulation in a resident block.
    sums = pl.pallas_call(
        _pool_kernel,
        out_shape=jax.ShapeDtypeStruct((B, C, 1), jnp.float32),
        grid=(B, n_c, n_t),
        in_specs=[pl.BlockSpec((1, c_tile, hw_tile), lambda b, ci, t: (b, ci, t))],
        out_specs=pl.BlockSpec((1, c_tile, 1), lambda b, ci, t: (b, ci, 0)),
        compiler_params=pltpu.CompilerParams(
            dimension_semantics=("parallel", "parallel", "arbitrary"),
            vmem_limit_bytes=_VMEM_LIMIT_BYTES),
    )(x_flat)

    # Gate: tiny FC (a few KFLOPs) in plain XLA, off the streaming path.
    pooled = sums[:, :, 0] * (1.0 / HW)                               # (B, C) f32
    h = jnp.maximum(pooled @ w1f + b1f, 0.0)
    y = jax.nn.sigmoid(h @ w2f + b2f.reshape(1, C))
    y3 = y.astype(x.dtype).reshape(B, C, 1)     # pre-cast: no per-step cast in-kernel

    # Pass 2: streaming channel-wise scale (all grid axes independent).
    out_flat = pl.pallas_call(
        _scale_kernel,
        out_shape=jax.ShapeDtypeStruct((B, C, HW), x.dtype),
        grid=(B, n_c, n_t),
        in_specs=[
            pl.BlockSpec((1, c_tile, 1), lambda b, ci, t: (b, ci, 0)),        # gate
            pl.BlockSpec((1, c_tile, hw_tile), lambda b, ci, t: (b, ci, t)),  # x tile
        ],
        out_specs=pl.BlockSpec((1, c_tile, hw_tile), lambda b, ci, t: (b, ci, t)),
        compiler_params=pltpu.CompilerParams(
            dimension_semantics=("parallel", "parallel", "parallel"),
            vmem_limit_bytes=_VMEM_LIMIT_BYTES),
    )(y3, x_flat)

    return out_flat.reshape(B, C, H, W)


def reference(x, w1, b1, w2, b2):
    pooled = x.mean(axis=(2, 3))
    h = jnp.maximum(pooled @ w1 + b1, 0.0)
    y = jax.nn.sigmoid(h @ w2 + b2)
    return x * y[:, :, None, None]


if __name__ == "__main__":
    # Shapes implied by the module: NCHW input, Linear(C, C//r), Linear(C//r, C).
    B, C, H, W = 2, 4, 16, 16
    reduction = 2
    Cr = C // reduction

    key = jax.random.PRNGKey(0)
    kx, kw1, kb1, kw2, kb2 = jax.random.split(key, 5)

    x = jax.random.normal(kx, (B, C, H, W), dtype=jnp.float32)
    # PyTorch Linear stores (out, in); we use the (in, out) convention here.
    w1 = jax.random.normal(kw1, (C, Cr), dtype=jnp.float32) * 0.1
    b1 = jax.random.normal(kb1, (Cr,), dtype=jnp.float32) * 0.1
    w2 = jax.random.normal(kw2, (Cr, C), dtype=jnp.float32) * 0.1
    b2 = jax.random.normal(kb2, (C,), dtype=jnp.float32) * 0.1

    ref = reference(x, w1, b1, w2, b2)

    # Fused fast path (default for small slabs).
    out_fused = attention_layer(x, w1, b1, w2, b2)
    jax.block_until_ready(out_fused)
    assert out_fused.shape == (B, C, H, W)
    assert jnp.allclose(out_fused, ref, atol=1e-5, rtol=1e-5), "fused path mismatch"

    # Two-pass streaming fallback (exercised here to keep it tested).
    out_twopass = attention_layer(x, w1, b1, w2, b2, force_two_pass=True)
    jax.block_until_ready(out_twopass)
    assert jnp.allclose(out_twopass, ref, atol=1e-5, rtol=1e-5), "two-pass path mismatch"

    print("KERNEL_OK")
</pallas_src>

<mosaic_0001>
module attributes {stable_mosaic.version = 11 : i64} {
  func.func @_fused_kernel(%arg0: i32, %arg1: memref<1x4x256xf32, #tpu.memory_space<vmem>>, %arg2: memref<4x2xf32, #tpu.memory_space<vmem>>, %arg3: memref<1x2xf32, #tpu.memory_space<vmem>>, %arg4: memref<4x2xf32, #tpu.memory_space<vmem>>, %arg5: memref<4x1xf32, #tpu.memory_space<vmem>>, %arg6: memref<1x4x256xf32, #tpu.memory_space<vmem>>) attributes {dimension_semantics = [#tpu.dimension_semantics<parallel>], iteration_bounds = array<i64: 2>, scalar_prefetch = 0 : i64, scratch_operands = 0 : i64, tpu.core_type = #tpu.core_type<tc>, window_params = [{transform_indices = @transform_0, window_bounds = array<i64: 1, 4, 256>}, {pipeline_mode = #tpu.pipeline_mode<synchronous>, transform_indices = @transform_1, window_bounds = array<i64: 4, 2>}, {pipeline_mode = #tpu.pipeline_mode<synchronous>, transform_indices = @transform_2, window_bounds = array<i64: 1, 2>}, {pipeline_mode = #tpu.pipeline_mode<synchronous>, transform_indices = @transform_3, window_bounds = array<i64: 4, 2>}, {pipeline_mode = #tpu.pipeline_mode<synchronous>, transform_indices = @transform_4, window_bounds = array<i64: 4, 1>}, {transform_indices = @transform_5, window_bounds = array<i64: 1, 4, 256>}]} {
    %c0 = arith.constant 0 : index
    %c0_0 = arith.constant 0 : index
    %c0_1 = arith.constant 0 : index
    %0 = vector.load %arg1[%c0, %c0_0, %c0_1] : memref<1x4x256xf32, #tpu.memory_space<vmem>>, vector<1x4x256xf32>
    %1 = vector.shape_cast %0 : vector<1x4x256xf32> to vector<4x256xf32>
    %cst = arith.constant dense<0.000000e+00> : vector<4xf32>
    %2 = vector.multi_reduction <add>, %1, %cst [1] : vector<4x256xf32> to vector<4xf32>
    %3 = vector.shape_cast %2 : vector<4xf32> to vector<4x1xf32>
    %cst_2 = arith.constant 3.906250e-03 : f32
    %4 = vector.broadcast %cst_2 : f32 to vector<4x1xf32>
    %5 = arith.mulf %3, %4 : vector<4x1xf32>
    %c0_3 = arith.constant 0 : index
    %c0_4 = arith.constant 0 : index
    %6 = vector.load %arg2[%c0_3, %c0_4] : memref<4x2xf32, #tpu.memory_space<vmem>>, vector<4x2xf32>
    %7 = vector.broadcast %5 : vector<4x1xf32> to vector<4x2xf32>
    %8 = arith.mulf %7, %6 : vector<4x2xf32>
    %cst_5 = arith.constant dense<0.000000e+00> : vector<2xf32>
    %9 = vector.multi_reduction <add>, %8, %cst_5 [0] : vector<4x2xf32> to vector<2xf32>
    %10 = vector.shape_cast %9 : vector<2xf32> to vector<1x2xf32>
    %c0_6 = arith.constant 0 : index
    %c0_7 = arith.constant 0 : index
    %11 = vector.load %arg3[%c0_6, %c0_7] : memref<1x2xf32, #tpu.memory_space<vmem>>, vector<1x2xf32>
    %12 = arith.addf %10, %11 : vector<1x2xf32>
    %cst_8 = arith.constant 0.000000e+00 : f32
    %13 = vector.broadcast %cst_8 : f32 to vector<1x2xf32>
    %14 = arith.maximumf %12, %13 : vector<1x2xf32>
    %c0_9 = arith.constant 0 : index
    %c0_10 = arith.constant 0 : index
    %15 = vector.load %arg4[%c0_9, %c0_10] : memref<4x2xf32, #tpu.memory_space<vmem>>, vector<4x2xf32>
    %16 = vector.broadcast %14 : vector<1x2xf32> to vector<4x2xf32>
    %17 = arith.mulf %16, %15 : vector<4x2xf32>
    %cst_11 = arith.constant dense<0.000000e+00> : vector<4xf32>
    %18 = vector.multi_reduction <add>, %17, %cst_11 [1] : vector<4x2xf32> to vector<4xf32>
    %19 = vector.shape_cast %18 : vector<4xf32> to vector<4x1xf32>
    %c0_12 = arith.constant 0 : index
    %c0_13 = arith.constant 0 : index
    %20 = vector.load %arg5[%c0_12, %c0_13] : memref<4x1xf32, #tpu.memory_space<vmem>>, vector<4x1xf32>
    %21 = arith.addf %19, %20 : vector<4x1xf32>
    %22 = arith.negf %21 : vector<4x1xf32>
    %23 = math.exp %22 : vector<4x1xf32>
    %cst_14 = arith.constant 1.000000e+00 : f32
    %24 = vector.broadcast %cst_14 : f32 to vector<4x1xf32>
    %25 = arith.addf %24, %23 : vector<4x1xf32>
    %26 = arith.divf %24, %25 : vector<4x1xf32>
    %27 = vector.broadcast %26 : vector<4x1xf32> to vector<4x256xf32>
    %28 = arith.mulf %1, %27 : vector<4x256xf32>
    %c0_15 = arith.constant 0 : index
    %c0_16 = arith.constant 0 : index
    %c0_17 = arith.constant 0 : index
    %29 = vector.load %arg6[%c0_15, %c0_16, %c0_17] : memref<1x4x256xf32, #tpu.memory_space<vmem>>, vector<1x4x256xf32>
    %30 = vector.shape_cast %29 : vector<1x4x256xf32> to vector<4x256xf32>
    %31 = vector.shape_cast %28 : vector<4x256xf32> to vector<1x4x256xf32>
    tpu.vector_store %arg6[%c0_15, %c0_16, %c0_17], %31 {strides = array<i32>} : memref<1x4x256xf32, #tpu.memory_space<vmem>>, vector<1x4x256xf32>,
    return
  }
  func.func @transform_0(%arg0: i32) -> (i32, i32, i32) {
    %c0_i32 = arith.constant 0 : i32
    %c0_i32_0 = arith.constant 0 : i32
    %c0_i32_1 = arith.constant 0 : i32
    return %arg0, %c0_i32, %c0_i32_0 : i32, i32, i32
  }
  func.func @transform_1(%arg0: i32) -> (i32, i32) {
    %c0_i32 = arith.constant 0 : i32
    %c0_i32_0 = arith.constant 0 : i32
    %c0_i32_1 = arith.constant 0 : i32
    return %c0_i32, %c0_i32_0 : i32, i32
  }
  func.func @transform_2(%arg0: i32) -> (i32, i32) {
    %c0_i32 = arith.constant 0 : i32
    %c0_i32_0 = arith.constant 0 : i32
    %c0_i32_1 = arith.constant 0 : i32
    return %c0_i32, %c0_i32_0 : i32, i32
  }
  func.func @transform_3(%arg0: i32) -> (i32, i32) {
    %c0_i32 = arith.constant 0 : i32
    %c0_i32_0 = arith.constant 0 : i32
    %c0_i32_1 = arith.constant 0 : i32
    return %c0_i32, %c0_i32_0 : i32, i32
  }
  func.func @transform_4(%arg0: i32) -> (i32, i32) {
    %c0_i32 = arith.constant 0 : i32
    %c0_i32_0 = arith.constant 0 : i32
    %c0_i32_1 = arith.constant 0 : i32
    return %c0_i32, %c0_i32_0 : i32, i32
  }
  func.func @transform_5(%arg0: i32) -> (i32, i32, i32) {
    %c0_i32 = arith.constant 0 : i32
    %c0_i32_0 = arith.constant 0 : i32
    %c0_i32_1 = arith.constant 0 : i32
    return %arg0, %c0_i32, %c0_i32_0 : i32, i32, i32
  }
}

</mosaic_0001>

<bundles_post_ra>
// kernel: tpu_custom_call.1
= control target key start
LH: loop header
LB: loop body
LE: loop exit
PB: predicated region body
PF: predicated region fallthrough
CT: control target
= control target key end

     0   :  { %10 = vsyncpa [#allocation3], 0  ;;  %s611_s0 = inlined_call_operand.vmem [shape: f32[2,4,256], index: 0, kind: input, shape index: {}]   ;;  %s612_s1 = inlined_call_operand.vmem [shape: f32[4,2], index: 1, kind: input, shape index: {}]   ;;  %s613_s2 = inlined_call_operand.vmem [shape: f32[1,2], index: 2, kind: input, shape index: {}]   ;;  %s614_s3 = inlined_call_operand.vmem [shape: f32[4,2], index: 3, kind: input, shape index: {}]   ;;  %s615_s4 = inlined_call_operand.vmem [shape: f32[4,1], index: 4, kind: input, shape index: {}]   ;;  %s616_s5 = inlined_call_operand.hbm [shape: f32[2,4,256], index: 5, kind: output, shape index: {}]  }
   0x1   :  { %12 = vsyncpa [#allocation3 + $0x1], 0  ;;  %s510_s18 = smov 0   ;;  %s512_s19 = smov 0  }
   0x2   :  { %s514_s20 = smov 0   ;;  %s516_s21 = smov 0  }
   0x3 LB: > { %s531_s22 = sadd.s32 4294967295, %s475_s21   ;;  %s352_s23 = sadd.s32 4294967294, %s475_s21   ;;  %s475_s21 = sphi %s516_s21, %s622_s21   ;;  %s471_s20 = sphi %s514_s20, %s621_s20   ;;  %s467_s19 = sphi %s512_s19, %s620_s19   ;;  %s463_s18 = sphi %s510_s18, %s619_s18  }
   0x4   : > { %s535_s24 = sadd.s32 1, %s475_s21   ;;  %s135_s25 = sadd.s32 1, %s471_s20 }
   0x5   : > { %s132_s26 = ssub.s32 %s475_s21, %s535_s24  ;;  %p145_p0 = scmp.ne.s32.totalorder %s471_s20, %s467_s19 }
   0x6   : > { %p133_p1 = scmp.eq.s32.totalorder %s132_s26, 0  ;;  %p146_p2 = scmp.eq.s32.totalorder %s531_s22, 1 }
   0x7   : > { %p151_p3 = scmp.ne.s32.totalorder %s467_s19, %s463_s18  ;;  %p152_p4 = scmp.eq.s32.totalorder %s352_s23, 1 }
   0x8   : > { %s546_s27 = scalar_select %p133_p1, %s471_s20, %s135_s25  }
   0x9   : > { %p548_p5 = por %p146_p2, %p145_p0  ;;  %p552_p6 = por %p152_p4, %p151_p3 }
   0xa   : > { %p355_p7 = scmp.ge.s32.totalorder %s475_s21, 1  ;;  %p190_p8 = scmp.lt.s32.totalorder %s475_s21, 3 }
   0xc   : > { %p191_p9 = pnand %p355_p7, %p190_p8 }
   0xd   : > { %p218_p10 = scmp.lt.s32.totalorder (!%p191_p9), %s531_s22, 1  ;;  %s215_s23 = sand.u32 (!%p191_p9), 1, %s467_s19  }
   0xe   : > { %194 = sbr.rel (%p191_p9) target bundleno = 506 (0x1fa), region = 40  ;;  %s356_s25 = sshll.u32 (!%p191_p9), %s215_s23, 3 }
   0xf   : > { %s366_s26 = sshll.u32 (!%p191_p9), %s531_s22, 7  ;;  %s279_s10 = scalar_lea.sflag (!%p191_p9), [#allocation3], %s215_s23 }
  0x10   : > { %s479_s12 = smov (!%p191_p9), [#allocation2]  }
  0x11   : > { %s419_s13 = sshll.u32 (!%p191_p9), %s479_s12, 4  ;;  %s420_s13 = int_to_ptr.vmem [resolvable:$false] %s419_s13 }
  0x13   : > { %s219_s30 = scalar_select %p218_p10, %s531_s22, 1  ;;  %vm227_vm0 = vcmask 1043456   ;;  %v234_v5 = vld [vmem:[%s612_s1] sm:$0xf]  ;;  %vm236_vm1 = vcmask 11264   ;;  %v248_v13 = vlaneseq  ;;  %v477_v26 = vmov 0  }
  0x14   : > { %v244_v17 = vld [vmem:[%s613_s2] sm:$0x1]  ;;  %408 = vset.pattern.permute.xlu1 %v477_v26  ;;  %409 = vset.pattern.permute.xlu0 %v477_v26  ;;  %v478_v34 = vmov 839922192   ;;  %s421_s22 = scalar_lea.vmem %s420_s13, 256 }
  0x15   : > { %s365_s6 = sshll.u32 %s219_s30, 3  ;;  %v249_v16 = vshrl.u32 %v248_v13, 7  ;;  %v247_v22 = vld [vmem:[%s614_s3] sm:$0xf]  ;;  %v269_v35 = vunpack.c.l.s4 %v478_v34  ;;  %s217_s30 = scalar_lea.vmem [#allocation2], %s356_s25 }
  0x16   : > { %s222_s9 = scalar_lea.vmem %s611_s0, %s365_s6  ;;  %v256_v27 = vld [vmem:[%s615_s4] sm:$0xf]  ;;  %s293_s6 = sshll.u32 %s217_s30, 4  ;;  %s294_s6 = int_to_ptr.vmem [resolvable:$true] %s293_s6 }
  0x17   : > { %v223_v0 = vld [vmem:[%s222_s9] sm:$0xff]  ;;  %v250_v20 = vsub.s32 0, %v249_v16  ;;  %v270_v36 = vunpack.c.0.s8 %v269_v35  ;;  %s291_s9 = scalar_lea.hbm %s616_s5, %s366_s26  ;;  %s415_s11 = scalar_lea.vmem %s294_s6, 128 }
  0x18   : > { %v225_v1 = vcombine.high %v223_v0, %v223_v0  ;;  %v228_v2 = vsel %vm227_vm0, %v223_v0, 0.0  ;;  %p416_p11 = scmp.ne.s32.totalorder %s294_s6, %s415_s11  ;;  %p422_p0 = scmp.lt.s32.totalorder %s294_s6, %s420_s13 }
  0x19   : > { %v273_v37 = vsub.s32 %v270_v36, %v249_v16  ;;  %p423_p1 = scmp.lt.s32.totalorder %s421_s22, %s415_s11 }
  0x1a   : > { %v229_v3 = vsel %vm227_vm0, %v225_v1, 0.0  ;;  %p417_p12 = pnand %p416_p11, %p548_p5 }
  0x1b   : > { %v230_v4 = vadd.f32 %v229_v3, %v228_v2  ;;  %p424_p2 = por %p423_p1, %p422_p0 }
  0x1c   : > { %p418_p13 = pneg %p417_p12 }
  0x1d   : > { %231 = vadd.xlane.f32.xlu0 %v230_v4 }
  0x1e   : > { %p425_p3 = pnand %p424_p2, %p418_p13 }
  0xa6   : > { %v232_v6 = vpop.xlane.xlu0 %231 }
  0xa7   : > { %v233_v7 = vmul.f32 0.00390625, %v232_v6 }
  0xa9   : > { %v235_v8 = vmul.f32 %v234_v5, %v233_v7 }
  0xab   : > { %v237_v9 = vsel %vm236_vm1, %v235_v8, 0.0 }
  0xac   : > { %v238_v10 = vrot.slane %v237_v9, 4 }
  0xae   : > { %v239_v11 = vadd.f32 %v238_v10, %v237_v9 }
  0xb0   : > { %v240_v12 = vrot.slane %v239_v11, 2 }
  0xb2   : > { %v241_v14 = vadd.f32 %v240_v12, %v239_v11 }
  0xb4   : > { %v242_v15 = vrot.slane %v241_v14, 1 }
  0xb6   : > { %v243_v18 = vadd.f32 %v242_v15, %v241_v14 }
  0xb8   : > { %v245_v19 = vadd.f32 %v244_v17, %v243_v18 }
  0xba   : > { %v246_v21 = vmax.f32 %v245_v19, 0.0 }
  0xbc   : > { %v251_v23 = vrot.slane %v246_v21, %v250_v20 }
  0xbe   : > { %v252_v24 = vmul.f32 %v251_v23, %v247_v22 }
  0xc0   : > { %v253_v25 = vsel %vm236_vm1, %v252_v24, 0.0 }
  0xc1   : > { %254 = vadd.xlane.f32.xlu0 %v253_v25 }
 0x14a   : > { %v255_v28 = vpop.xlane.xlu0 %254 }
 0x14b   : > { %v257_v29 = vadd.f32 %v256_v27, %v255_v28 }
 0x14d   : > { %v359_v30 = vmul.f32 -1.442695, %v257_v29 }
 0x14f   : > { %411 = vpow2.f32 %v359_v30 }
 0x15c   : > { %v412_v31 = vpop.eup %411 }
 0x15d   : > { %v261_v32 = vadd.f32 1.0, %v412_v31 }
 0x15f   : > { %413 = vrcp.f32 %v261_v32 }
 0x16c   : > { %v414_v33 = vpop.eup %413 }
 0x16d   : > { %266 = vperm.xlu1 %408, %v414_v33  }
 0x1e8   : > { %v267_v38 = vpop.permute.xlu1 %266 }
 0x1e9   : > { %v274_v39 = vrot.slane %v267_v38, %v273_v37 }
 0x1eb   : > { %v276_v40 = vmul.f32 %v274_v39, %v223_v0 }
 0x1ed   : > { %277 = vst [vmem:[%s217_s30] sm:$0xff] %v276_v40 }
 0x1ee   : > { %428 = shalt.err (!%p425_p3)
}
 0x1ef   : > { %s429_s14 = scalar_lea.hbm %s291_s9, 128  ;;  %s433_s17 = scalar_lea.hbm %s616_s5, 256 }
 0x1f0   : > { %p430_p4 = scmp.ne.s32.totalorder %s291_s9, %s429_s14  ;;  %p434_p9 = scmp.lt.s32.totalorder %s291_s9, %s616_s5 }
 0x1f1   : > { %p435_p10 = scmp.lt.s32.totalorder %s433_s17, %s429_s14 }
 0x1f2   : > { %p431_p7 = pnand %p430_p4, %p548_p5 }
 0x1f3   : > { %p436_p11 = por %p435_p10, %p434_p9 }
 0x1f4   : > { %p432_p8 = pneg %p431_p7 }
 0x1f6   : > { %p437_p12 = pnand %p436_p11, %p432_p8 }
 0x1f8   : > { %440 = shalt.err (!%p437_p12)
}
 0x1f9   : > { %367 = dma.vmem_to_hbm [thread:$0]  (%p548_p5), %s294_s6, 128, %s291_s9, %s279_s10  }
 0x1fa PF: > { %p373_p13 = scmp.ge.s32.totalorder %s475_s21, 2  ;;  %s305_s26 = sand.u32 1, %s463_s18  }
 0x1fb   : > { %s306_s30 = scalar_lea.sflag [#allocation3], %s305_s26 }
 0x1fc   : > { %p370_p0 = pnand %p373_p13, %p552_p6 }
 0x1fe   : > { %p371_p1 = pneg %p370_p0 }
 0x200   : > { %458 = dma.done.wait (%p371_p1), %s306_s30, 128  }
 0x201   : > { %460 = vsyncadd (%p371_p1), %s306_s30, 4294967168  ;;  %p15_p2 = scmp.ge.s32.totalorder %s535_s24, 4   ;;  %s619_s18 = smov %s467_s19 }
 0x202   : > { %s620_s19 = smov %s471_s20  ;;  %s621_s20 = smov %s546_s27 }
 0x203   : > { %s622_s21 = smov %s535_s24  ;;  %17 = sbr.rel (!%p15_p2) target bundleno = 3 (0x3), region = 75 }
 0x208   :  { %311 = vsyncpa [#allocation3], 1 }
 0x209   :  { %313 = vsyncpa [#allocation3 + $0x1], 1 }

</bundles_post_ra>
